<compile_context>
chip_gen: v6e
topology: v6e:2x2x1
jax: 0.10.0
libtpu: 0.0.40
codegen_flags: <defaults>
</compile_context>

<pallas_src>
import functools

import jax
import jax.numpy as jnp
from jax.experimental import pallas as pl
from jax.experimental.pallas import tpu as pltpu

_LANES = 128
_SUBLANES = 8
_MAX_BLOCK_ROWS = 4096   # (4096, 128) f32 = 2 MiB / input / buffer


def _tensorcores_per_chip():
    # v7x has 2 TensorCores per chip sharing 3.2 TB/s HBM; v5e/v6e have 1.
    try:
        kind = jax.devices()[0].device_kind.lower()
    except Exception:  # no devices visible -> be conservative
        return 1
    return 2 if "v7" in kind else 1


def _sublane_granule(dtype):
    # Minimum sublane multiple for a packed dtype: 8 (4B), 16 (2B), 32 (1B).
    itemsize = jnp.dtype(dtype).itemsize
    return _SUBLANES * max(1, 4 // itemsize)


def _masked_mae_kernel(pred_ref, tgt_ref, sum_ref, cnt_ref, *,
                       block_rows, blocks_per_core, num_blocks, num_cores,
                       rows_in_last):
    i = pl.program_id(1)

    @pl.when(i == 0)
    def _init():
        sum_ref[...] = jnp.zeros_like(sum_ref)
        cnt_ref[...] = jnp.zeros_like(cnt_ref)

    if num_cores == 1:
        gb = i
    else:
        gb = pl.program_id(0) * blocks_per_core + i

    groups = block_rows // _SUBLANES

    def _accumulate(mask, p, t):
        err = jnp.where(mask, jnp.abs(p - t), 0.0)
        cnt = mask.astype(jnp.int32)
        # Fold (block_rows, 128) -> (8, 128) with pure VPU adds (the reshape
        # stays on (8, 128) tile boundaries, so no XLU work in the hot loop).
        sum_ref[0] += jnp.sum(err.reshape(groups, _SUBLANES, _LANES), axis=0)
        cnt_ref[0] += jnp.sum(cnt.reshape(groups, _SUBLANES, _LANES), axis=0)

    def _body():
        p = pred_ref[...].astype(jnp.float32)
        t = tgt_ref[...].astype(jnp.float32)
        finite = jnp.isfinite(t)
        if rows_in_last == block_rows:
            # No ragged tail anywhere: single fast path, isfinite mask only.
            _accumulate(finite, p, t)
        else:
            # Interior blocks: no iota / row masking at all.
            @pl.when(gb < num_blocks - 1)
            def _interior():
                _accumulate(finite, p, t)

            # Ragged last block: mask DMA-clipped stale rows with a static
            # row threshold (no scalar adds folded into the iota).
            @pl.when(gb == num_blocks - 1)
            def _last():
                row_ids = jax.lax.broadcasted_iota(
                    jnp.int32, (block_rows, _LANES), 0)
                _accumulate(jnp.logical_and(finite, row_ids < rows_in_last),
                            p, t)

    if num_cores * blocks_per_core == num_blocks:
        _body()
    else:
        # At most one clamped duplicate tail iteration on the last core:
        # skip all VMEM loads / compute (the clamped index_map already keeps
        # Pallas from issuing a new DMA because the block index repeats).
        pl.when(gb < num_blocks)(_body)


def masked_mae_graphwavenet(pred, target):
    """Masked MAE (GraphWavenet-style): returns (mae, valid_count).

    mae is NaN when valid_count == 0.  (The PyTorch module returns a bare NaN
    tensor in that case; under jit we keep the static (mae, valid) structure
    and encode it as (NaN, 0).)
    """
    pred = jnp.asarray(pred)
    target = jnp.asarray(target)

    flat_p = pred.reshape(-1)
    flat_t = target.reshape(-1)
    n = flat_p.shape[0]

    if n == 0:
        return jnp.float32(jnp.nan), jnp.int32(0)

    granule = max(_sublane_granule(pred.dtype), _sublane_granule(target.dtype))
    min_elems = granule * _LANES

    # Pad only when the element count is not lane-aligned (or tiny).  Padded
    # target elements are NaN -> excluded by the isfinite mask; padded pred
    # elements are 0 and masked anyway.
    padded_n = max(-(-n // _LANES) * _LANES, min_elems)
    pad = padded_n - n
    if pad:
        flat_p = jnp.pad(flat_p, (0, pad))
        flat_t = jnp.pad(flat_t, (0, pad), constant_values=jnp.nan)

    rows = padded_n // _LANES
    p2 = flat_p.reshape(rows, _LANES)
    t2 = flat_t.reshape(rows, _LANES)

    # Big lane-dense blocks (never larger than the array), rounded to the
    # packed-dtype sublane granule (8 for f32, 16 for bf16, 32 for int8).
    block_rows = min(_MAX_BLOCK_ROWS, (rows // granule) * granule)
    num_blocks = -(-rows // block_rows)
    rows_in_last = rows - (num_blocks - 1) * block_rows

    num_cores = min(_tensorcores_per_chip(), num_blocks)
    blocks_per_core = -(-num_blocks // num_cores)
    max_block = num_blocks - 1

    if num_cores == 1:
        def in_index_map(c, i):
            return (i, 0)
    else:
        def in_index_map(c, i):
            # Clamp the (at most one) out-of-range tail iteration on the last
            # core onto an already-seen block; the kernel skips its compute.
            return (jnp.minimum(c * blocks_per_core + i, max_block), 0)

    kernel = functools.partial(
        _masked_mae_kernel,
        block_rows=block_rows,
        blocks_per_core=blocks_per_core,
        num_blocks=num_blocks,
        num_cores=num_cores,
        rows_in_last=rows_in_last,
    )

    # TODO(synk): on v7x, if xprof shows only one TensorCore streaming, switch
    # the leading-axis semantic to pltpu.CORE_PARALLEL to force the 2-way split.
    sum_out, cnt_out = pl.pallas_call(
        kernel,
        out_shape=(
            jax.ShapeDtypeStruct((num_cores, _SUBLANES, _LANES), jnp.float32),
            jax.ShapeDtypeStruct((num_cores, _SUBLANES, _LANES), jnp.int32),
        ),
        grid_spec=pltpu.PrefetchScalarGridSpec(
            num_scalar_prefetch=0,
            grid=(num_cores, blocks_per_core),
            in_specs=[
                pl.BlockSpec((block_rows, _LANES), in_index_map),
                pl.BlockSpec((block_rows, _LANES), in_index_map),
            ],
            out_specs=[
                pl.BlockSpec((1, _SUBLANES, _LANES), lambda c, i: (c, 0, 0)),
                pl.BlockSpec((1, _SUBLANES, _LANES), lambda c, i: (c, 0, 0)),
            ],
        ),
        compiler_params=pltpu.CompilerParams(
            dimension_semantics=("parallel", "arbitrary"),
        ),
    )(p2, t2)

    total = jnp.sum(sum_out)
    valid = jnp.sum(cnt_out)            # exact int32 count
    # TODO(synk): int32 valid-count overflows above ~2.1e9 finite elements.
    mae = jnp.where(valid > 0, total / valid.astype(jnp.float32),
                    jnp.float32(jnp.nan))
    return mae, valid


def _reference(pred, target):
    t = jnp.asarray(target, jnp.float32)
    p = jnp.asarray(pred, jnp.float32)
    mask = jnp.isfinite(t)
    valid = jnp.sum(mask).astype(jnp.int32)
    err = jnp.where(mask, jnp.abs(p - t), 0.0)
    mae = jnp.where(valid > 0, jnp.sum(err) / valid.astype(jnp.float32),
                    jnp.float32(jnp.nan))
    return mae, valid


if __name__ == "__main__":
    key = jax.random.PRNGKey(0)
    keys = jax.random.split(key, 9)

    # Test 1: GraphWavenet-style (batch, horizon, nodes, features) with a
    # lane-aligned element count (pad-free fast path, no ragged block).
    shape1 = (2, 4, 16, 16)
    pred1 = jax.random.normal(keys[0], shape1, dtype=jnp.float32)
    tgt1 = jax.random.normal(keys[1], shape1, dtype=jnp.float32)
    tgt1 = jnp.where(jax.random.bernoulli(keys[2], p=0.25, shape=shape1),
                     jnp.nan, tgt1)
    mae1, valid1 = masked_mae_graphwavenet(pred1, tgt1)
    jax.block_until_ready((mae1, valid1))
    mae1_ref, valid1_ref = _reference(pred1, tgt1)
    assert int(valid1) == int(valid1_ref), (int(valid1), int(valid1_ref))
    assert jnp.allclose(mae1, mae1_ref, rtol=1e-5, atol=1e-6), (mae1, mae1_ref)

    # Test 2: non-lane-aligned size (METR-LA-like nodes=207) exercising the
    # NaN lane padding and the ragged last block (static-threshold row mask).
    shape2 = (4, 12, 207, 1)
    pred2 = jax.random.normal(keys[3], shape2, dtype=jnp.float32)
    tgt2 = jax.random.normal(keys[4], shape2, dtype=jnp.float32)
    tgt2 = jnp.where(jax.random.bernoulli(keys[5], p=0.1, shape=shape2),
                     jnp.nan, tgt2)
    mae2, valid2 = masked_mae_graphwavenet(pred2, tgt2)
    jax.block_until_ready((mae2, valid2))
    mae2_ref, valid2_ref = _reference(pred2, tgt2)
    assert int(valid2) == int(valid2_ref), (int(valid2), int(valid2_ref))
    assert jnp.allclose(mae2, mae2_ref, rtol=1e-5, atol=1e-6), (mae2, mae2_ref)

    # Test 3: bf16 inputs (packed-dtype sublane granule = 16).
    shape3 = (3, 5, 50, 2)
    pred3 = jax.random.normal(keys[6], shape3, dtype=jnp.bfloat16)
    tgt3 = jax.random.normal(keys[7], shape3, dtype=jnp.bfloat16)
    tgt3 = jnp.where(jax.random.bernoulli(keys[8], p=0.2, shape=shape3),
                     jnp.nan, tgt3)
    mae3, valid3 = masked_mae_graphwavenet(pred3, tgt3)
    jax.block_until_ready((mae3, valid3))
    mae3_ref, valid3_ref = _reference(pred3, tgt3)
    assert int(valid3) == int(valid3_ref), (int(valid3), int(valid3_ref))
    assert jnp.allclose(mae3, mae3_ref, rtol=1e-4, atol=1e-5), (mae3, mae3_ref)

    # Test 4: all-NaN target -> (NaN, 0), matching the module's degenerate case.
    pred4 = jax.random.normal(keys[0], (2, 3, 8, 4), dtype=jnp.float32)
    tgt4 = jnp.full((2, 3, 8, 4), jnp.nan, dtype=jnp.float32)
    mae4, valid4 = masked_mae_graphwavenet(pred4, tgt4)
    jax.block_until_ready((mae4, valid4))
    assert int(valid4) == 0, int(valid4)
    assert bool(jnp.isnan(mae4)), mae4

    print("KERNEL_OK")
</pallas_src>

<mosaic_0001>
module attributes {stable_mosaic.version = 11 : i64} {
  func.func @_masked_mae_kernel(%arg0: i32, %arg1: i32, %arg2: memref<16x128xf32, #tpu.memory_space<vmem>>, %arg3: memref<16x128xf32, #tpu.memory_space<vmem>>, %arg4: memref<1x8x128xf32, #tpu.memory_space<vmem>>, %arg5: memref<1x8x128xi32, #tpu.memory_space<vmem>>) attributes {dimension_semantics = [#tpu.dimension_semantics<parallel>, #tpu.dimension_semantics<arbitrary>], iteration_bounds = array<i64: 1, 1>, scalar_prefetch = 0 : i64, scratch_operands = 0 : i64, tpu.core_type = #tpu.core_type<tc>, window_params = [{transform_indices = @transform_0, window_bounds = array<i64: 16, 128>}, {transform_indices = @transform_1, window_bounds = array<i64: 16, 128>}, {transform_indices = @transform_2, window_bounds = array<i64: 1, 8, 128>}, {transform_indices = @transform_3, window_bounds = array<i64: 1, 8, 128>}]} {
    %c0_i32 = arith.constant 0 : i32
    %0 = arith.cmpi eq, %arg1, %c0_i32 : i32
    %1 = arith.extui %0 : i1 to i32
    %c0_i32_0 = arith.constant 0 : i32
    %2 = arith.cmpi ne, %1, %c0_i32_0 : i32
    scf.if %2 {
      %cst_19 = arith.constant 0.000000e+00 : f32
      %28 = vector.broadcast %cst_19 : f32 to vector<1x8x128xf32>
      %c0_20 = arith.constant 0 : index
      %c0_21 = arith.constant 0 : index
      %c0_22 = arith.constant 0 : index
      %29 = vector.load %arg4[%c0_20, %c0_21, %c0_22] : memref<1x8x128xf32, #tpu.memory_space<vmem>>, vector<1x8x128xf32>
      tpu.vector_store %arg4[%c0_20, %c0_21, %c0_22], %28 {strides = array<i32>} : memref<1x8x128xf32, #tpu.memory_space<vmem>>, vector<1x8x128xf32>,
      %c0_i32_23 = arith.constant 0 : i32
      %30 = vector.broadcast %c0_i32_23 : i32 to vector<1x8x128xi32>
      %c0_24 = arith.constant 0 : index
      %c0_25 = arith.constant 0 : index
      %c0_26 = arith.constant 0 : index
      %31 = vector.load %arg5[%c0_24, %c0_25, %c0_26] : memref<1x8x128xi32, #tpu.memory_space<vmem>>, vector<1x8x128xi32>
      tpu.vector_store %arg5[%c0_24, %c0_25, %c0_26], %30 {strides = array<i32>} : memref<1x8x128xi32, #tpu.memory_space<vmem>>, vector<1x8x128xi32>,
    } else {
    }
    %c0 = arith.constant 0 : index
    %c0_1 = arith.constant 0 : index
    %3 = vector.load %arg2[%c0, %c0_1] : memref<16x128xf32, #tpu.memory_space<vmem>>, vector<16x128xf32>
    %c0_2 = arith.constant 0 : index
    %c0_3 = arith.constant 0 : index
    %4 = vector.load %arg3[%c0_2, %c0_3] : memref<16x128xf32, #tpu.memory_space<vmem>>, vector<16x128xf32>
    %5 = tpu.weird %4 : vector<16x128xf32> -> vector<16x128xi1>
    %cst = arith.constant dense<true> : vector<16x128xi1>
    %6 = arith.xori %5, %cst : vector<16x128xi1>
    %7 = arith.subf %3, %4 : vector<16x128xf32>
    %8 = math.absf %7 : vector<16x128xf32>
    %cst_4 = arith.constant 0.000000e+00 : f32
    %9 = vector.broadcast %cst_4 : f32 to vector<16x128xf32>
    %10 = arith.select %6, %8, %9 : vector<16x128xi1>, vector<16x128xf32>
    %11 = arith.extui %6 : vector<16x128xi1> to vector<16x128xi32>
    %c0_5 = arith.constant 0 : index
    %c0_6 = arith.constant 0 : index
    %c0_7 = arith.constant 0 : index
    %12 = vector.load %arg4[%c0_5, %c0_6, %c0_7] : memref<1x8x128xf32, #tpu.memory_space<vmem>>, vector<1x8x128xf32>
    %13 = vector.shape_cast %12 : vector<1x8x128xf32> to vector<8x128xf32>
    %14 = vector.shape_cast %10 : vector<16x128xf32> to vector<2x8x128xf32>
    %cst_8 = arith.constant dense<0.000000e+00> : vector<8x128xf32>
    %15 = vector.multi_reduction <add>, %14, %cst_8 [0] : vector<2x8x128xf32> to vector<8x128xf32>
    %16 = arith.addf %13, %15 : vector<8x128xf32>
    %c0_9 = arith.constant 0 : index
    %c0_10 = arith.constant 0 : index
    %c0_11 = arith.constant 0 : index
    %17 = vector.load %arg4[%c0_9, %c0_10, %c0_11] : memref<1x8x128xf32, #tpu.memory_space<vmem>>, vector<1x8x128xf32>
    %18 = vector.shape_cast %17 : vector<1x8x128xf32> to vector<8x128xf32>
    %19 = vector.shape_cast %16 : vector<8x128xf32> to vector<1x8x128xf32>
    tpu.vector_store %arg4[%c0_9, %c0_10, %c0_11], %19 {strides = array<i32>} : memref<1x8x128xf32, #tpu.memory_space<vmem>>, vector<1x8x128xf32>,
    %c0_12 = arith.constant 0 : index
    %c0_13 = arith.constant 0 : index
    %c0_14 = arith.constant 0 : index
    %20 = vector.load %arg5[%c0_12, %c0_13, %c0_14] : memref<1x8x128xi32, #tpu.memory_space<vmem>>, vector<1x8x128xi32>
    %21 = vector.shape_cast %20 : vector<1x8x128xi32> to vector<8x128xi32>
    %22 = vector.shape_cast %11 : vector<16x128xi32> to vector<2x8x128xi32>
    %cst_15 = arith.constant dense<0> : vector<8x128xi32>
    %23 = vector.multi_reduction <add>, %22, %cst_15 [0] : vector<2x8x128xi32> to vector<8x128xi32>
    %24 = arith.addi %21, %23 : vector<8x128xi32>
    %c0_16 = arith.constant 0 : index
    %c0_17 = arith.constant 0 : index
    %c0_18 = arith.constant 0 : index
    %25 = vector.load %arg5[%c0_16, %c0_17, %c0_18] : memref<1x8x128xi32, #tpu.memory_space<vmem>>, vector<1x8x128xi32>
    %26 = vector.shape_cast %25 : vector<1x8x128xi32> to vector<8x128xi32>
    %27 = vector.shape_cast %24 : vector<8x128xi32> to vector<1x8x128xi32>
    tpu.vector_store %arg5[%c0_16, %c0_17, %c0_18], %27 {strides = array<i32>} : memref<1x8x128xi32, #tpu.memory_space<vmem>>, vector<1x8x128xi32>,
    return
  }
  func.func @transform_0(%arg0: i32, %arg1: i32) -> (i32, i32) {
    %c0_i32 = arith.constant 0 : i32
    %c0_i32_0 = arith.constant 0 : i32
    return %arg1, %c0_i32 : i32, i32
  }
  func.func @transform_1(%arg0: i32, %arg1: i32) -> (i32, i32) {
    %c0_i32 = arith.constant 0 : i32
    %c0_i32_0 = arith.constant 0 : i32
    return %arg1, %c0_i32 : i32, i32
  }
  func.func @transform_2(%arg0: i32, %arg1: i32) -> (i32, i32, i32) {
    %c0_i32 = arith.constant 0 : i32
    %c0_i32_0 = arith.constant 0 : i32
    %c0_i32_1 = arith.constant 0 : i32
    return %arg0, %c0_i32, %c0_i32_0 : i32, i32, i32
  }
  func.func @transform_3(%arg0: i32, %arg1: i32) -> (i32, i32, i32) {
    %c0_i32 = arith.constant 0 : i32
    %c0_i32_0 = arith.constant 0 : i32
    %c0_i32_1 = arith.constant 0 : i32
    return %arg0, %c0_i32, %c0_i32_0 : i32, i32, i32
  }
}

</mosaic_0001>

<bundles_post_ra>
// kernel: tpu_custom_call.1
= control target key start
LH: loop header
LB: loop body
LE: loop exit
PB: predicated region body
PF: predicated region fallthrough
CT: control target
= control target key end

     0   :  { %9 = vsyncpa [#allocation3], 0  ;;  %s240_s0 = inlined_call_operand.hbm [shape: f32[16,128], index: 0, kind: input, shape index: {}]   ;;  %s241_s1 = inlined_call_operand.hbm [shape: f32[16,128], index: 1, kind: input, shape index: {}]   ;;  %s242_s2 = inlined_call_operand.hbm [shape: f32[1,8,128], index: 2, kind: output, shape index: {0}]   ;;  %s243_s3 = inlined_call_operand.hbm [shape: s32[1,8,128], index: 3, kind: output, shape index: {1}]  }
   0x1   :  { %10 = vsyncpa [#allocation6], 0 }
   0x2   :  { %11 = vsyncpa [#allocation4], 0 }
   0x3   :  { %12 = vsyncpa [#allocation9], 0  ;;  %s200_s12 = smov [#allocation2]  }
   0x4   :  { %s18_s13 = sshll.u32 %s200_s12, 4  ;;  %s19_s13 = int_to_ptr.vmem [resolvable:$true] %s18_s13 }
   0x5   :  { %s120_s14 = scalar_lea.vmem %s19_s13, 256  ;;  %p125_p1 = scmp.lt.s32.totalorder %s19_s13, %s19_s13 }
   0x6   :  { %p121_p0 = scmp.ne.s32.totalorder %s19_s13, %s120_s14  ;;  %p126_p2 = scmp.lt.s32.totalorder %s120_s14, %s120_s14 }
   0x8   :  { %p127_p3 = por %p126_p2, %p125_p1 }
   0xa   :  { %p128_p4 = pnand %p127_p3, %p121_p0 }
   0xc   :  { %131 = shalt.err (!%p128_p4)
}
   0xd   :  { %s201_s15 = smov 128   ;;  %s202_s16 = smov 8  }
   0xe   :  { %24 = dma.hbm_to_vmem [thread:$0]  %s240_s0, 256, %s19_s13, [#allocation3], %s201_s15, %s201_s15, %s202_s16  }
   0xf   :  { %s203_s19 = smov [#allocation5]  }
  0x10   :  { %s30_s20 = sshll.u32 %s203_s19, 4  ;;  %s31_s20 = int_to_ptr.vmem [resolvable:$true] %s30_s20 }
  0x11   :  { %s140_s21 = scalar_lea.vmem %s31_s20, 256  ;;  %p145_p6 = scmp.lt.s32.totalorder %s31_s20, %s31_s20 }
  0x12   :  { %p141_p5 = scmp.ne.s32.totalorder %s31_s20, %s140_s21  ;;  %p146_p7 = scmp.lt.s32.totalorder %s140_s21, %s140_s21 }
  0x14   :  { %p147_p8 = por %p146_p7, %p145_p6 }
  0x16   :  { %p148_p9 = pnand %p147_p8, %p141_p5 }
  0x18   :  { %151 = shalt.err (!%p148_p9)
}
  0x19   :  { %36 = dma.hbm_to_vmem [thread:$0]  %s241_s1, 256, %s31_s20, [#allocation6], %s201_s15, %s201_s15, %s202_s16  }
  0x1a   :  { %192 = dma.done.wait [#allocation3], 256  }
  0x1b   :  { %193 = vsyncadd [#allocation3], 4294967040 }
  0x1c   :  { %194 = dma.done.wait [#allocation6], 256  }
  0x1d   :  { %195 = vsyncadd [#allocation6], 4294967040  ;;  %v49_v0 = vld [vmem:[#allocation2] sm:$0xff]  ;;  %v50_v1 = vld [vmem:[#allocation2 + $0x8] sm:$0xff]  ;;  %vm204_vm2 = vmmov 1   ;;  %v205_v7 = vmov 0  }
  0x1e   :  { %v51_v2 = vld [vmem:[#allocation5] sm:$0xff]  ;;  %v52_v3 = vld [vmem:[#allocation5 + $0x8] sm:$0xff]  ;;  %s206_s0 = smov [#allocation8]   ;;  %s207_s24 = smov [#allocation7]  }
  0x1f   :  { %vm53_vm0 = vweird.f32 %v51_v2  ;;  %v57_v4 = vsub.f32 %v49_v0, %v51_v2  ;;  %vm54_vm1 = vweird.f32 %v52_v3  ;;  %v58_v5 = vsub.f32 %v50_v1, %v52_v3  ;;  %s89_s1 = sshll.u32 %s206_s0, 4  ;;  %s79_s25 = sshll.u32 %s207_s24, 4  ;;  %s90_s1 = int_to_ptr.vmem [resolvable:$true] %s89_s1  ;;  %s80_s25 = int_to_ptr.vmem [resolvable:$true] %s79_s25 }
  0x20   :  { %vm55_vm3 = vmxor %vm53_vm0, %vm204_vm2  ;;  %s152_s26 = scalar_lea.vmem %s90_s1, 128  ;;  %p157_p11 = scmp.lt.s32.totalorder %s90_s1, %s90_s1 }
  0x21   :  { %vm56_vm4 = vmxor %vm54_vm1, %vm204_vm2  ;;  %v59_v6 = vand.u32 2147483647, %v57_v4  ;;  %v63_v8 = vsel %vm55_vm3, 1, %v205_v7  ;;  %v60_v9 = vand.u32 2147483647, %v58_v5  ;;  %p153_p10 = scmp.ne.s32.totalorder %s90_s1, %s152_s26  ;;  %p158_p12 = scmp.lt.s32.totalorder %s152_s26, %s152_s26 }
  0x22   :  { %v64_v10 = vsel %vm56_vm4, 1, %v205_v7 }
  0x23   :  { %v61_v11 = vsel %vm55_vm3, %v59_v6, 0.0  ;;  %v70_v12 = vadd.s32 %v64_v10, %v63_v8  ;;  %v62_v13 = vsel %vm56_vm4, %v60_v9, 0.0  ;;  %p159_p13 = por %p158_p12, %p157_p11 }
  0x24   :  { %v66_v14 = vadd.f32 %v62_v13, %v61_v11 }
  0x25   :  { %72 = vst [vmem:[#allocation8] sm:$0xff] %v70_v12  ;;  %p160_p0 = pnand %p159_p13, %p153_p10 }
  0x27   :  { %163 = shalt.err (!%p160_p0)
}
  0x28   :  { %92 = dma.vmem_to_hbm [thread:$0]  %s90_s1, 128, %s243_s3, [#allocation9]   ;;  %68 = vst [vmem:[#allocation7] sm:$0xff] %v66_v14 }
  0x29   :  { %s172_s29 = scalar_lea.vmem %s80_s25, 128  ;;  %p177_p2 = scmp.lt.s32.totalorder %s80_s25, %s80_s25 }
  0x2a   :  { %p173_p1 = scmp.ne.s32.totalorder %s80_s25, %s172_s29  ;;  %p178_p3 = scmp.lt.s32.totalorder %s172_s29, %s172_s29 }
  0x2c   :  { %p179_p4 = por %p178_p3, %p177_p2 }
  0x2e   :  { %p180_p5 = pnand %p179_p4, %p173_p1 }
  0x30   :  { %183 = shalt.err (!%p180_p5)
}
  0x31   :  { %82 = dma.vmem_to_hbm [thread:$0]  %s80_s25, 128, %s242_s2, [#allocation4]  }
  0x32   :  { %196 = dma.done.wait [#allocation4], 128  }
  0x33   :  { %197 = vsyncadd [#allocation4], 4294967168 }
  0x34   :  { %198 = dma.done.wait [#allocation9], 128  }
  0x35   :  { %199 = vsyncadd [#allocation9], 4294967168 }
  0x36   :  { %99 = vsyncpa [#allocation3], 1 }
  0x37   :  { %100 = vsyncpa [#allocation6], 1 }
  0x38   :  { %101 = vsyncpa [#allocation4], 1 }
  0x39   :  { %102 = vsyncpa [#allocation9], 1 }

</bundles_post_ra>
